<compile_context>
chip_gen: v5e
topology: v5e:2x2
jax: 0.10.0
libtpu: 0.0.40
codegen_flags: <defaults>
</compile_context>

<pallas_src>
import functools

import jax
import jax.numpy as jnp
from jax.experimental import pallas as pl
from jax.experimental.pallas import tpu as pltpu

LANE = 128


def _round_up(n, m):
    return ((n + m - 1) // m) * m


def _mlp_kernel(x_ref, w1, w2, w3, w4, w5, w6, b_ref, o_ref, *, pdims):
    """One batch tile through all six Linear+ReLU layers.

    x_ref : (TB, pdims[0])        f32 activation tile
    w{i}  : (pdims[i-1], pdims[i]) bf16 weights, VMEM-resident across the grid
    b_ref : (8, max_out)          f32 packed biases, row l = bias of layer l
    o_ref : (TB, pdims[6])        f32 output tile (lane-dense, multiple of 128)
    """
    w_refs = (w1, w2, w3, w4, w5, w6)
    h = x_ref[...].astype(jnp.bfloat16)              # bf16 into the MXU
    for l, w_ref in enumerate(w_refs):
        out_d = pdims[l + 1]
        acc = jnp.dot(h, w_ref[...], preferred_element_type=jnp.float32)
        acc = acc + b_ref[l:l + 1, :out_d]           # f32 bias add (VPU)
        acc = jnp.maximum(acc, 0.0)                  # f32 ReLU (VPU)
        if l + 1 < len(w_refs):
            h = acc.astype(jnp.bfloat16)
        else:
            o_ref[...] = acc.astype(o_ref.dtype)


def pack_params(params):
    """Pad feature dims to multiples of 128, cast W -> bf16, stack biases."""
    dims = [params[0][0].shape[0]] + [w.shape[1] for w, _ in params]
    pdims = tuple(_round_up(d, LANE) for d in dims)

    ws = []
    for i, (w, _) in enumerate(params):
        wp = jnp.zeros((pdims[i], pdims[i + 1]), jnp.float32)
        wp = wp.at[: w.shape[0], : w.shape[1]].set(w)
        ws.append(wp.astype(jnp.bfloat16))

    max_out = max(pdims[1:])
    bstack = jnp.zeros((8, max_out), jnp.float32)    # 8 rows: sublane aligned
    for i, (_, b) in enumerate(params):
        b = jnp.reshape(b, (-1,))
        bstack = bstack.at[i, : b.shape[0]].set(b)
    return tuple(ws), bstack, pdims


def mlp_forward(x, ws, bstack, pdims):
    """x: (B, D) f32.  ws/bstack/pdims from pack_params."""
    B, D = x.shape
    din, dout = pdims[0], pdims[-1]

    # Batch tile: big enough to feed the 128/256-wide MXU; grid over the rest.
    if B >= 256:
        tb = 256
    elif B >= 128:
        tb = 128
    else:
        tb = _round_up(B, 8)
    Bp = _round_up(B, tb)

    xp = jnp.zeros((Bp, din), x.dtype).at[:B, :D].set(x)

    # VMEM budget: resident weights/biases + double-buffered I/O tiles +
    # intermediate activations, with 2x headroom, capped at 64 MiB for v7x.
    # TODO(synk): for large input_dim, tile the fc3/fc4 (4D x 8D) weights over
    # a K/N grid axis with an f32 VMEM accumulator instead of keeping the full
    # weight set resident (needed once weights exceed v7x's 64 MiB VMEM).
    resident = sum(w.size * w.dtype.itemsize for w in ws)
    resident += bstack.size * bstack.dtype.itemsize
    io = 2 * (tb * din + tb * dout) * 4
    act = 4 * tb * max(pdims) * 4
    vmem_limit = int(min(max(2 * (resident + io + act), 32 << 20), 64 << 20))

    grid = (Bp // tb,)
    out = pl.pallas_call(
        functools.partial(_mlp_kernel, pdims=pdims),
        out_shape=jax.ShapeDtypeStruct((Bp, dout), x.dtype),
        grid=grid,
        in_specs=(
            [pl.BlockSpec((tb, din), lambda i: (i, 0))]
            + [pl.BlockSpec(w.shape, lambda i: (0, 0)) for w in ws]
            + [pl.BlockSpec(bstack.shape, lambda i: (0, 0))]
        ),
        out_specs=pl.BlockSpec((tb, dout), lambda i: (i, 0)),
        compiler_params=pltpu.CompilerParams(
            dimension_semantics=("parallel",),
            vmem_limit_bytes=vmem_limit,
        ),
    )(xp, *ws, bstack)
    return out[:B, :D]


def init_params(key, input_dim):
    """nn.Linear-style init; W stored as (in, out) so y = x @ W + b."""
    dims = [input_dim, 2 * input_dim, 4 * input_dim, 8 * input_dim,
            4 * input_dim, 2 * input_dim, input_dim]
    params = []
    for i in range(6):
        key, kw, kb = jax.random.split(key, 3)
        fan_in, fan_out = dims[i], dims[i + 1]
        bound = 1.0 / (fan_in ** 0.5)
        w = jax.random.uniform(kw, (fan_in, fan_out), jnp.float32,
                               minval=-bound, maxval=bound)
        b = jax.random.uniform(kb, (fan_out,), jnp.float32,
                               minval=-bound, maxval=bound)
        params.append((w, b))
    return params


def mlp_reference_f32(x, params):
    h = x
    for w, b in params:
        h = jnp.maximum(h @ w + b[None, :], 0.0)
    return h


def mlp_reference_bf16(x, params):
    """Same cast pattern as the kernel: bf16 matmul inputs, f32 accumulate."""
    h = x
    for w, b in params:
        y = jnp.dot(h.astype(jnp.bfloat16), w.astype(jnp.bfloat16),
                    preferred_element_type=jnp.float32)
        h = jnp.maximum(y + b[None, :], 0.0)
    return h


if __name__ == "__main__":
    key = jax.random.PRNGKey(0)
    batch, input_dim = 8, 32

    kx, kp, kx2 = jax.random.split(key, 3)
    params = init_params(kp, input_dim)
    ws, bstack, pdims = pack_params(params)

    # Small case (matches the module's tiny demo shapes).
    x = jax.random.normal(kx, (batch, input_dim), jnp.float32)
    out = jax.block_until_ready(mlp_forward(x, ws, bstack, pdims))
    assert out.shape == (batch, input_dim)
    assert jnp.allclose(out, mlp_reference_bf16(x, params), atol=5e-3, rtol=5e-3)
    assert jnp.allclose(out, mlp_reference_f32(x, params), atol=5e-2, rtol=5e-2)

    # Larger batch: exercises the batch grid (256-row tiles) with VMEM-resident
    # weights and the "parallel" batch axis (megacore on v7x).
    x_big = jax.random.normal(kx2, (512, input_dim), jnp.float32)
    out_big = jax.block_until_ready(mlp_forward(x_big, ws, bstack, pdims))
    assert out_big.shape == (512, input_dim)
    assert jnp.allclose(out_big, mlp_reference_bf16(x_big, params),
                        atol=5e-3, rtol=5e-3)

    print("KERNEL_OK")
</pallas_src>

<mosaic_0001>
module attributes {stable_mosaic.version = 11 : i64} {
  func.func @_mlp_kernel(%arg0: i32, %arg1: memref<8x128xf32, #tpu.memory_space<vmem>>, %arg2: memref<128x128xbf16, #tpu.memory_space<vmem>>, %arg3: memref<128x128xbf16, #tpu.memory_space<vmem>>, %arg4: memref<128x256xbf16, #tpu.memory_space<vmem>>, %arg5: memref<256x128xbf16, #tpu.memory_space<vmem>>, %arg6: memref<128x128xbf16, #tpu.memory_space<vmem>>, %arg7: memref<128x128xbf16, #tpu.memory_space<vmem>>, %arg8: memref<8x256xf32, #tpu.memory_space<vmem>>, %arg9: memref<8x128xf32, #tpu.memory_space<vmem>>) attributes {dimension_semantics = [#tpu.dimension_semantics<parallel>], iteration_bounds = array<i64: 1>, scalar_prefetch = 0 : i64, scratch_operands = 0 : i64, tpu.core_type = #tpu.core_type<tc>, window_params = [{transform_indices = @transform_0, window_bounds = array<i64: 8, 128>}, {pipeline_mode = #tpu.pipeline_mode<synchronous>, transform_indices = @transform_1, window_bounds = array<i64: 128, 128>}, {pipeline_mode = #tpu.pipeline_mode<synchronous>, transform_indices = @transform_2, window_bounds = array<i64: 128, 128>}, {pipeline_mode = #tpu.pipeline_mode<synchronous>, transform_indices = @transform_3, window_bounds = array<i64: 128, 256>}, {pipeline_mode = #tpu.pipeline_mode<synchronous>, transform_indices = @transform_4, window_bounds = array<i64: 256, 128>}, {pipeline_mode = #tpu.pipeline_mode<synchronous>, transform_indices = @transform_5, window_bounds = array<i64: 128, 128>}, {pipeline_mode = #tpu.pipeline_mode<synchronous>, transform_indices = @transform_6, window_bounds = array<i64: 128, 128>}, {pipeline_mode = #tpu.pipeline_mode<synchronous>, transform_indices = @transform_7, window_bounds = array<i64: 8, 256>}, {transform_indices = @transform_8, window_bounds = array<i64: 8, 128>}]} {
    %c0 = arith.constant 0 : index
    %c0_0 = arith.constant 0 : index
    %0 = vector.load %arg1[%c0, %c0_0] : memref<8x128xf32, #tpu.memory_space<vmem>>, vector<8x128xf32>
    %1 = arith.truncf %0 : vector<8x128xf32> to vector<8x128xbf16>
    %c0_1 = arith.constant 0 : index
    %c0_2 = arith.constant 0 : index
    %2 = vector.load %arg2[%c0_1, %c0_2] : memref<128x128xbf16, #tpu.memory_space<vmem>>, vector<128x128xbf16>
    %cst = arith.constant dense<0.000000e+00> : vector<8x128xf32>
    %3 = tpu.matmul %1, %2, %cst {dimension_numbers = #tpu.dot_dimension_numbers<[1], [0], [0], [1], [0, 0, 1, 1], [], []>} : vector<8x128xbf16>, vector<128x128xbf16>, vector<8x128xf32> -> vector<8x128xf32>
    %c0_3 = arith.constant 0 : index
    %c0_4 = arith.constant 0 : index
    %4 = vector.load %arg8[%c0_3, %c0_4] : memref<8x256xf32, #tpu.memory_space<vmem>>, vector<1x128xf32>
    %5 = vector.broadcast %4 : vector<1x128xf32> to vector<8x128xf32>
    %6 = arith.addf %3, %5 : vector<8x128xf32>
    %cst_5 = arith.constant 0.000000e+00 : f32
    %7 = vector.broadcast %cst_5 : f32 to vector<8x128xf32>
    %8 = arith.maximumf %6, %7 : vector<8x128xf32>
    %9 = arith.truncf %8 : vector<8x128xf32> to vector<8x128xbf16>
    %c0_6 = arith.constant 0 : index
    %c0_7 = arith.constant 0 : index
    %10 = vector.load %arg3[%c0_6, %c0_7] : memref<128x128xbf16, #tpu.memory_space<vmem>>, vector<128x128xbf16>
    %cst_8 = arith.constant dense<0.000000e+00> : vector<8x128xf32>
    %11 = tpu.matmul %9, %10, %cst_8 {dimension_numbers = #tpu.dot_dimension_numbers<[1], [0], [0], [1], [0, 0, 1, 1], [], []>} : vector<8x128xbf16>, vector<128x128xbf16>, vector<8x128xf32> -> vector<8x128xf32>
    %c1 = arith.constant 1 : index
    %c0_9 = arith.constant 0 : index
    %12 = vector.load %arg8[%c1, %c0_9] : memref<8x256xf32, #tpu.memory_space<vmem>>, vector<1x128xf32>
    %13 = vector.broadcast %12 : vector<1x128xf32> to vector<8x128xf32>
    %14 = arith.addf %11, %13 : vector<8x128xf32>
    %cst_10 = arith.constant 0.000000e+00 : f32
    %15 = vector.broadcast %cst_10 : f32 to vector<8x128xf32>
    %16 = arith.maximumf %14, %15 : vector<8x128xf32>
    %17 = arith.truncf %16 : vector<8x128xf32> to vector<8x128xbf16>
    %c0_11 = arith.constant 0 : index
    %c0_12 = arith.constant 0 : index
    %18 = vector.load %arg4[%c0_11, %c0_12] : memref<128x256xbf16, #tpu.memory_space<vmem>>, vector<128x256xbf16>
    %cst_13 = arith.constant dense<0.000000e+00> : vector<8x256xf32>
    %19 = tpu.matmul %17, %18, %cst_13 {dimension_numbers = #tpu.dot_dimension_numbers<[1], [0], [0], [1], [0, 0, 1, 1], [], []>} : vector<8x128xbf16>, vector<128x256xbf16>, vector<8x256xf32> -> vector<8x256xf32>
    %c2 = arith.constant 2 : index
    %c0_14 = arith.constant 0 : index
    %20 = vector.load %arg8[%c2, %c0_14] : memref<8x256xf32, #tpu.memory_space<vmem>>, vector<1x256xf32>
    %21 = vector.broadcast %20 : vector<1x256xf32> to vector<8x256xf32>
    %22 = arith.addf %19, %21 : vector<8x256xf32>
    %cst_15 = arith.constant 0.000000e+00 : f32
    %23 = vector.broadcast %cst_15 : f32 to vector<8x256xf32>
    %24 = arith.maximumf %22, %23 : vector<8x256xf32>
    %25 = arith.truncf %24 : vector<8x256xf32> to vector<8x256xbf16>
    %c0_16 = arith.constant 0 : index
    %c0_17 = arith.constant 0 : index
    %26 = vector.load %arg5[%c0_16, %c0_17] : memref<256x128xbf16, #tpu.memory_space<vmem>>, vector<256x128xbf16>
    %cst_18 = arith.constant dense<0.000000e+00> : vector<8x128xf32>
    %27 = tpu.matmul %25, %26, %cst_18 {dimension_numbers = #tpu.dot_dimension_numbers<[1], [0], [0], [1], [0, 0, 1, 1], [], []>} : vector<8x256xbf16>, vector<256x128xbf16>, vector<8x128xf32> -> vector<8x128xf32>
    %c3 = arith.constant 3 : index
    %c0_19 = arith.constant 0 : index
    %28 = vector.load %arg8[%c3, %c0_19] : memref<8x256xf32, #tpu.memory_space<vmem>>, vector<1x128xf32>
    %29 = vector.broadcast %28 : vector<1x128xf32> to vector<8x128xf32>
    %30 = arith.addf %27, %29 : vector<8x128xf32>
    %cst_20 = arith.constant 0.000000e+00 : f32
    %31 = vector.broadcast %cst_20 : f32 to vector<8x128xf32>
    %32 = arith.maximumf %30, %31 : vector<8x128xf32>
    %33 = arith.truncf %32 : vector<8x128xf32> to vector<8x128xbf16>
    %c0_21 = arith.constant 0 : index
    %c0_22 = arith.constant 0 : index
    %34 = vector.load %arg6[%c0_21, %c0_22] : memref<128x128xbf16, #tpu.memory_space<vmem>>, vector<128x128xbf16>
    %cst_23 = arith.constant dense<0.000000e+00> : vector<8x128xf32>
    %35 = tpu.matmul %33, %34, %cst_23 {dimension_numbers = #tpu.dot_dimension_numbers<[1], [0], [0], [1], [0, 0, 1, 1], [], []>} : vector<8x128xbf16>, vector<128x128xbf16>, vector<8x128xf32> -> vector<8x128xf32>
    %c4 = arith.constant 4 : index
    %c0_24 = arith.constant 0 : index
    %36 = vector.load %arg8[%c4, %c0_24] : memref<8x256xf32, #tpu.memory_space<vmem>>, vector<1x128xf32>
    %37 = vector.broadcast %36 : vector<1x128xf32> to vector<8x128xf32>
    %38 = arith.addf %35, %37 : vector<8x128xf32>
    %cst_25 = arith.constant 0.000000e+00 : f32
    %39 = vector.broadcast %cst_25 : f32 to vector<8x128xf32>
    %40 = arith.maximumf %38, %39 : vector<8x128xf32>
    %41 = arith.truncf %40 : vector<8x128xf32> to vector<8x128xbf16>
    %c0_26 = arith.constant 0 : index
    %c0_27 = arith.constant 0 : index
    %42 = vector.load %arg7[%c0_26, %c0_27] : memref<128x128xbf16, #tpu.memory_space<vmem>>, vector<128x128xbf16>
    %cst_28 = arith.constant dense<0.000000e+00> : vector<8x128xf32>
    %43 = tpu.matmul %41, %42, %cst_28 {dimension_numbers = #tpu.dot_dimension_numbers<[1], [0], [0], [1], [0, 0, 1, 1], [], []>} : vector<8x128xbf16>, vector<128x128xbf16>, vector<8x128xf32> -> vector<8x128xf32>
    %c5 = arith.constant 5 : index
    %c0_29 = arith.constant 0 : index
    %44 = vector.load %arg8[%c5, %c0_29] : memref<8x256xf32, #tpu.memory_space<vmem>>, vector<1x128xf32>
    %45 = vector.broadcast %44 : vector<1x128xf32> to vector<8x128xf32>
    %46 = arith.addf %43, %45 : vector<8x128xf32>
    %cst_30 = arith.constant 0.000000e+00 : f32
    %47 = vector.broadcast %cst_30 : f32 to vector<8x128xf32>
    %48 = arith.maximumf %46, %47 : vector<8x128xf32>
    %c0_31 = arith.constant 0 : index
    %c0_32 = arith.constant 0 : index
    %49 = vector.load %arg9[%c0_31, %c0_32] : memref<8x128xf32, #tpu.memory_space<vmem>>, vector<8x128xf32>
    tpu.vector_store %arg9[%c0_31, %c0_32], %48 {strides = array<i32>} : memref<8x128xf32, #tpu.memory_space<vmem>>, vector<8x128xf32>,
    return
  }
  func.func @transform_0(%arg0: i32) -> (i32, i32) {
    %c0_i32 = arith.constant 0 : i32
    %c0_i32_0 = arith.constant 0 : i32
    return %arg0, %c0_i32 : i32, i32
  }
  func.func @transform_1(%arg0: i32) -> (i32, i32) {
    %c0_i32 = arith.constant 0 : i32
    %c0_i32_0 = arith.constant 0 : i32
    %c0_i32_1 = arith.constant 0 : i32
    return %c0_i32, %c0_i32_0 : i32, i32
  }
  func.func @transform_2(%arg0: i32) -> (i32, i32) {
    %c0_i32 = arith.constant 0 : i32
    %c0_i32_0 = arith.constant 0 : i32
    %c0_i32_1 = arith.constant 0 : i32
    return %c0_i32, %c0_i32_0 : i32, i32
  }
  func.func @transform_3(%arg0: i32) -> (i32, i32) {
    %c0_i32 = arith.constant 0 : i32
    %c0_i32_0 = arith.constant 0 : i32
    %c0_i32_1 = arith.constant 0 : i32
    return %c0_i32, %c0_i32_0 : i32, i32
  }
  func.func @transform_4(%arg0: i32) -> (i32, i32) {
    %c0_i32 = arith.constant 0 : i32
    %c0_i32_0 = arith.constant 0 : i32
    %c0_i32_1 = arith.constant 0 : i32
    return %c0_i32, %c0_i32_0 : i32, i32
  }
  func.func @transform_5(%arg0: i32) -> (i32, i32) {
    %c0_i32 = arith.constant 0 : i32
    %c0_i32_0 = arith.constant 0 : i32
    %c0_i32_1 = arith.constant 0 : i32
    return %c0_i32, %c0_i32_0 : i32, i32
  }
  func.func @transform_6(%arg0: i32) -> (i32, i32) {
    %c0_i32 = arith.constant 0 : i32
    %c0_i32_0 = arith.constant 0 : i32
    %c0_i32_1 = arith.constant 0 : i32
    return %c0_i32, %c0_i32_0 : i32, i32
  }
  func.func @transform_7(%arg0: i32) -> (i32, i32) {
    %c0_i32 = arith.constant 0 : i32
    %c0_i32_0 = arith.constant 0 : i32
    %c0_i32_1 = arith.constant 0 : i32
    return %c0_i32, %c0_i32_0 : i32, i32
  }
  func.func @transform_8(%arg0: i32) -> (i32, i32) {
    %c0_i32 = arith.constant 0 : i32
    %c0_i32_0 = arith.constant 0 : i32
    return %arg0, %c0_i32 : i32, i32
  }
}

</mosaic_0001>

<bundles_post_ra>
// kernel: tpu_custom_call.1
= control target key start
LH: loop header
LB: loop body
LE: loop exit
PB: predicated region body
PF: predicated region fallthrough
CT: control target
= control target key end

     0   :  { %13 = vsyncpa [#allocation3], 0  ;;  %s1445_s0 = inlined_call_operand.hbm [shape: f32[8,128], index: 0, kind: input, shape index: {}]   ;;  %s1446_s1 = inlined_call_operand.hbm [shape: bf16[128,128], index: 1, kind: input, shape index: {}]   ;;  %s1447_s2 = inlined_call_operand.hbm [shape: bf16[128,128], index: 2, kind: input, shape index: {}]   ;;  %s1448_s3 = inlined_call_operand.hbm [shape: bf16[128,256], index: 3, kind: input, shape index: {}]   ;;  %s1449_s4 = inlined_call_operand.hbm [shape: bf16[256,128], index: 4, kind: input, shape index: {}]   ;;  %s1450_s5 = inlined_call_operand.hbm [shape: bf16[128,128], index: 5, kind: input, shape index: {}]   ;;  %s1451_s6 = inlined_call_operand.hbm [shape: bf16[128,128], index: 6, kind: input, shape index: {}]   ;;  %s1452_s7 = inlined_call_operand.hbm [shape: f32[8,256], index: 7, kind: input, shape index: {}]   ;;  %s1453_s8 = inlined_call_operand.hbm [shape: f32[8,128], index: 8, kind: output, shape index: {}]  }
   0x1   :  { %14 = vsyncpa [#allocation6], 0 }
   0x2   :  { %15 = vsyncpa [#allocation9], 0 }
   0x3   :  { %16 = vsyncpa [#allocation12], 0 }
   0x4   :  { %17 = vsyncpa [#allocation15], 0  ;;  %s34_s29 = sshll.u32 %s1446_s1, 4  ;;  %s35_s29 = int_to_ptr.hbm [resolvable:$true] %s34_s29 }
   0x5   :  { %18 = vsyncpa [#allocation4], 0  ;;  %s1345_s30 = smov [#allocation5]   ;;  %s60_s12 = sshll.u32 %s1448_s3, 4  ;;  %s61_s12 = int_to_ptr.hbm [resolvable:$true] %s60_s12 }
   0x6   :  { %s36_s9 = sshll.u32 %s1345_s30, 4  ;;  %s1346_s13 = smov 64   ;;  %s37_s9 = int_to_ptr.vmem [resolvable:$true] %s36_s9 }
   0x7   :  { %s1347_s14 = smov 4   ;;  %s1348_s15 = smov [#allocation8]  }
   0x8   :  { %42 = dma.hbm_to_vmem [thread:$0]  %s35_s29, 1024, %s37_s9, [#allocation6], %s1346_s13, %s1346_s13, %s1347_s14  }
   0x9   :  { %s62_s16 = sshll.u32 %s1348_s15, 4  ;;  %s1349_s1 = smov 128   ;;  %s63_s16 = int_to_ptr.vmem [resolvable:$true] %s62_s16 }
   0xa   :  { %s1350_s17 = smov 8   ;;  %s86_s20 = sshll.u32 %s1450_s5, 4  ;;  %s87_s20 = int_to_ptr.hbm [resolvable:$true] %s86_s20 }
   0xb   :  { %68 = dma.hbm_to_vmem [thread:$0]  %s61_s12, 2048, %s63_s16, [#allocation9], %s1349_s1, %s1349_s1, %s1350_s17  }
   0xc   :  { %s1351_s21 = smov [#allocation11]   ;;  %s24_s24 = sshll.u32 %s1445_s0, 4  ;;  %s25_s24 = int_to_ptr.hbm [resolvable:$true] %s24_s24 }
   0xd   :  { %s88_s3 = sshll.u32 %s1351_s21, 4  ;;  %s1352_s25 = smov [#allocation2]   ;;  %s89_s3 = int_to_ptr.vmem [resolvable:$true] %s88_s3 }
   0xe   :  { %94 = dma.hbm_to_vmem [thread:$0]  %s87_s20, 1024, %s89_s3, [#allocation12], %s1346_s13, %s1346_s13, %s1347_s14  }
   0xf   :  { %s26_s26 = sshll.u32 %s1352_s25, 4  ;;  %s47_s29 = sshll.u32 %s1447_s2, 4  ;;  %s27_s26 = int_to_ptr.vmem [resolvable:$true] %s26_s26  ;;  %s48_s29 = int_to_ptr.hbm [resolvable:$true] %s47_s29 }
  0x10   :  { %29 = dma.hbm_to_vmem [thread:$0]  %s25_s24, 128, %s27_s26, [#allocation3]  }
  0x11   :  { %s73_s9 = sshll.u32 %s1449_s4, 4  ;;  %s1353_s10 = smov [#allocation7]   ;;  %s74_s9 = int_to_ptr.hbm [resolvable:$true] %s73_s9 }
  0x12   :  { %s49_s0 = sshll.u32 %s1353_s10, 4  ;;  %s1354_s11 = smov [#allocation10]   ;;  %s50_s0 = int_to_ptr.vmem [resolvable:$true] %s49_s0 }
  0x13   :  { %55 = dma.hbm_to_vmem [thread:$0]  %s48_s29, 1024, %s50_s0, [#allocation6], %s1346_s13, %s1346_s13, %s1347_s14  }
  0x14   :  { %s75_s12 = sshll.u32 %s1354_s11, 4  ;;  %s99_s2 = sshll.u32 %s1451_s6, 4  ;;  %s76_s12 = int_to_ptr.vmem [resolvable:$true] %s75_s12  ;;  %s100_s2 = int_to_ptr.hbm [resolvable:$true] %s99_s2 }
  0x15   :  { %81 = dma.hbm_to_vmem [thread:$0]  %s74_s9, 2048, %s76_s12, [#allocation9], %s1346_s13, %s1346_s13, %s1347_s14  }
  0x16   :  { %s113_s17 = sshll.u32 %s1452_s7, 4  ;;  %s1355_s18 = smov [#allocation13]   ;;  %s114_s17 = int_to_ptr.hbm [resolvable:$true] %s113_s17 }
  0x17   :  { %s101_s19 = sshll.u32 %s1355_s18, 4  ;;  %s1356_s20 = smov [#allocation14]   ;;  %s102_s19 = int_to_ptr.vmem [resolvable:$true] %s101_s19 }
  0x18   :  { %107 = dma.hbm_to_vmem [thread:$0]  %s100_s2, 1024, %s102_s19, [#allocation12], %s1346_s13, %s1346_s13, %s1347_s14  }
  0x19   :  { %s115_s6 = sshll.u32 %s1356_s20, 4  ;;  %s116_s6 = int_to_ptr.vmem [resolvable:$true] %s115_s6 }
  0x1a   :  { %118 = dma.hbm_to_vmem [thread:$0]  %s114_s17, 256, %s116_s6, [#allocation15]  }
  0x1b   :  { %1333 = dma.done.wait [#allocation3], 128  }
  0x1c   :  { %1334 = vsyncadd [#allocation3], 4294967168 }
  0x1d   :  { %1335 = dma.done.wait [#allocation6], 2048  }
  0x1e   :  { %1336 = vsyncadd [#allocation6], 4294965248 }
  0x1f   :  { %1337 = dma.done.wait [#allocation9], 4096  }
  0x20   :  { %1338 = vsyncadd [#allocation9], 4294963200 }
  0x21   :  { %1339 = dma.done.wait [#allocation12], 2048  }
  0x22   :  { %1340 = vsyncadd [#allocation12], 4294965248 }
  0x23   :  { %1341 = dma.done.wait [#allocation15], 256  }
  0x24   :  { %1342 = vsyncadd [#allocation15], 4294967040  ;;  %v1047_v0 = vld [vmem:[#allocation5 + $0x38] sm:$0xff]  ;;  %v1046_v1 = vld [vmem:[#allocation5 + $0x30] sm:$0xff]  ;;  %s1357_s7 = smov [#allocation16]   ;;  %s770_s3 = sshll.u32 %s1453_s8, 4  ;;  %s771_s3 = int_to_ptr.hbm [resolvable:$true] %s770_s3 }
  0x25   :  { %218 = vmatpush.bf16.msra.mxu0 %v1047_v0  ;;  %v1055_v2 = vld [vmem:[#allocation7 + $0x38] sm:$0xff]  ;;  %v1054_v3 = vld [vmem:[#allocation7 + $0x30] sm:$0xff]  ;;  %v1045_v4 = vld [vmem:[#allocation5 + $0x28] sm:$0xff]  ;;  %s768_s13 = sshll.u32 %s1357_s7, 4  ;;  %s769_s13 = int_to_ptr.vmem [resolvable:$true] %s768_s13 }
  0x26   :  { %298 = vmatpush.bf16.msra.mxu1 %v1055_v2  ;;  %v1053_v5 = vld [vmem:[#allocation7 + $0x28] sm:$0xff]  ;;  %v1044_v6 = vld [vmem:[#allocation5 + $0x20] sm:$0xff]  ;;  %v1043_v8 = vld [vmem:[#allocation5 + $0x18] sm:$0xff] }
  0x27   :  { %v1052_v7 = vld [vmem:[#allocation7 + $0x20] sm:$0xff]  ;;  %v1051_v9 = vld [vmem:[#allocation7 + $0x18] sm:$0xff]  ;;  %v1042_v10 = vld [vmem:[#allocation5 + $0x10] sm:$0xff] }
  0x28   :  { %v1050_v11 = vld [vmem:[#allocation7 + $0x10] sm:$0xff]  ;;  %v1041_v12 = vld [vmem:[#allocation5 + $0x8] sm:$0xff]  ;;  %v1040_v13 = vld [vmem:[#allocation5] sm:$0xff] }
  0x29   :  { %219 = vmatpush.bf16.msra.mxu0 %v1046_v1  ;;  %v151_v14 = vld [vmem:[#allocation2] sm:$0xff]  ;;  %v1049_v16 = vld [vmem:[#allocation7 + $0x8] sm:$0xff]  ;;  %v1048_v17 = vld [vmem:[#allocation7] sm:$0xff] }
  0x2a   :  { %299 = vmatpush.bf16.msra.mxu1 %v1054_v3  ;;  %v152_v15 = vpack.c.bf16 %v151_v14, %v151_v14  ;;  %v906_v18 = vld [vmem:[#allocation8 + $0x70] sm:$0xf]  ;;  %v1071_v19 = vld [vmem:[#allocation8 + $0x74] sm:$0xf0]  ;;  %v1070_v20 = vld [vmem:[#allocation8 + $0x74] sm:$0xf] }
  0x2b   :  { %v907_v21 = vor.u32 %v1071_v19, %v906_v18  ;;  %v908_v22 = vld [vmem:[#allocation8 + $0x78] sm:$0xf0]  ;;  %v898_v23 = vld [vmem:[#allocation8 + $0x60] sm:$0xf]  ;;  %v1069_v24 = vld [vmem:[#allocation8 + $0x64] sm:$0xf0] }
  0x2c   :  { %v911_v25 = vor.u32 %v1070_v20, %v908_v22  ;;  %v1068_v26 = vld [vmem:[#allocation8 + $0x64] sm:$0xf]  ;;  %v900_v27 = vld [vmem:[#allocation8 + $0x68] sm:$0xf0]  ;;  %v899_v28 = vor.u32 %v1069_v24, %v898_v23  ;;  %v890_v30 = vld [vmem:[#allocation8 + $0x50] sm:$0xf] }
  0x2d   :  { %220 = vmatpush.bf16.msra.mxu0 %v1045_v4  ;;  %416 = vmatpush.bf16.msra.mxu2 %v907_v21  ;;  %v903_v29 = vor.u32 %v1068_v26, %v900_v27  ;;  %v1067_v31 = vld [vmem:[#allocation8 + $0x54] sm:$0xf0]  ;;  %v1066_v32 = vld [vmem:[#allocation8 + $0x54] sm:$0xf]  ;;  %v892_v33 = vld [vmem:[#allocation8 + $0x58] sm:$0xf0] }
  0x2e   :  { %300 = vmatpush.bf16.msra.mxu1 %v1053_v5  ;;  %429 = vmatpush.bf16.msra.mxu3 %v911_v25  ;;  %v891_v34 = vor.u32 %v1067_v31, %v890_v30  ;;  %v895_v35 = vor.u32 %v1066_v32, %v892_v33  ;;  %v882_v36 = vld [vmem:[#allocation8 + $0x40] sm:$0xf]  ;;  %v1065_v37 = vld [vmem:[#allocation8 + $0x44] sm:$0xf0]  ;;  %v1064_v38 = vld [vmem:[#allocation8 + $0x44] sm:$0xf] }
  0x2f   :  { %v884_v39 = vld [vmem:[#allocation8 + $0x48] sm:$0xf0]  ;;  %v883_v40 = vor.u32 %v1065_v37, %v882_v36  ;;  %v874_v42 = vld [vmem:[#allocation8 + $0x30] sm:$0xf]  ;;  %v1063_v43 = vld [vmem:[#allocation8 + $0x34] sm:$0xf0] }
  0x30   :  { %v887_v41 = vor.u32 %v1064_v38, %v884_v39  ;;  %v1062_v44 = vld [vmem:[#allocation8 + $0x34] sm:$0xf]  ;;  %v876_v45 = vld [vmem:[#allocation8 + $0x38] sm:$0xf0]  ;;  %v875_v46 = vor.u32 %v1063_v43, %v874_v42  ;;  %v866_v48 = vld [vmem:[#allocation8 + $0x20] sm:$0xf] }
  0x31   :  { %221 = vmatpush.bf16.msra.mxu0 %v1044_v6  ;;  %417 = vmatpush.bf16.msra.mxu2 %v899_v28  ;;  %v879_v47 = vor.u32 %v1062_v44, %v876_v45  ;;  %v1061_v49 = vld [vmem:[#allocation8 + $0x24] sm:$0xf0]  ;;  %v1060_v50 = vld [vmem:[#allocation8 + $0x24] sm:$0xf]  ;;  %v868_v51 = vld [vmem:[#allocation8 + $0x28] sm:$0xf0] }
  0x32   :  { %301 = vmatpush.bf16.msra.mxu1 %v1052_v7  ;;  %430 = vmatpush.bf16.msra.mxu3 %v903_v29  ;;  %v867_v52 = vor.u32 %v1061_v49, %v866_v48  ;;  %v871_v53 = vor.u32 %v1060_v50, %v868_v51  ;;  %v169_v54 = vld [vmem:[#allocation14] ss:$0 sm:$0xff]  ;;  %v858_v60 = vld [vmem:[#allocation8 + $0x10] sm:$0xf]  ;;  %v1059_v61 = vld [vmem:[#allocation8 + $0x14] sm:$0xf0] }
  0x33   :  { %v1058_v62 = vld [vmem:[#allocation8 + $0x14] sm:$0xf]  ;;  %v859_v63 = vor.u32 %v1059_v61, %v858_v60  ;;  %v860_v0 = vld [vmem:[#allocation8 + $0x18] sm:$0xf0]  ;;  %v850_v2 = vld [vmem:[#allocation8] sm:$0xf] }
  0x34   :  { %v863_v1 = vor.u32 %v1058_v62, %v860_v0  ;;  %v1057_v3 = vld [vmem:[#allocation8 + $0x4] sm:$0xf0]  ;;  %v1056_v4 = vld [vmem:[#allocation8 + $0x4] sm:$0xf]  ;;  %v852_v6 = vld [vmem:[#allocation8 + $0x8] sm:$0xf0] }
  0x35   :  { %222 = vmatpush.bf16.msra.mxu0 %v1043_v8  ;;  %418 = vmatpush.bf16.msra.mxu2 %v891_v34  ;;  %v851_v5 = vor.u32 %v1057_v3, %v850_v2  ;;  %v855_v7 = vor.u32 %v1056_v4, %v852_v6  ;;  %v1079_v8 = vld [vmem:[#allocation10 + $0x38] sm:$0xff]  ;;  %v1076_v14 = vld [vmem:[#allocation10 + $0x20] sm:$0xff]  ;;  %v1074_v18 = vld [vmem:[#allocation10 + $0x10] sm:$0xff] }
  0x36   :  { %302 = vmatpush.bf16.msra.mxu1 %v1051_v9  ;;  %431 = vmatpush.bf16.msra.mxu3 %v895_v35  ;;  %v1087_v9 = vld [vmem:[#allocation10 + $0x78] sm:$0xff]  ;;  %v1082_v19 = vld [vmem:[#allocation10 + $0x50] sm:$0xff]  ;;  %v249_v20 = vld [vmem:[#allocation14 + $0x1] ss:$0 sm:$0xff] }
  0x37   :  { %v1073_v26 = vld [vmem:[#allocation10 + $0x8] sm:$0xff]  ;;  %v1072_v28 = vld [vmem:[#allocation10] sm:$0xff]  ;;  %v1095_v30 = vld [vmem:[#allocation11 + $0x38] sm:$0xff] }
  0x38   :  { %v1081_v27 = vld [vmem:[#allocation10 + $0x48] sm:$0xff]  ;;  %v1080_v29 = vld [vmem:[#allocation10 + $0x40] sm:$0xff]  ;;  %v1094_v31 = vld [vmem:[#allocation11 + $0x30] sm:$0xff] }
  0x39   :  { %223 = vmatpush.bf16.msra.mxu0 %v1042_v10  ;;  %419 = vmatpush.bf16.msra.mxu2 %v883_v40  ;;  %v1078_v10 = vld [vmem:[#allocation10 + $0x30] sm:$0xff]  ;;  %v1093_v32 = vld [vmem:[#allocation11 + $0x28] sm:$0xff]  ;;  %v1092_v33 = vld [vmem:[#allocation11 + $0x20] sm:$0xff] }
  0x3a   :  { %303 = vmatpush.bf16.msra.mxu1 %v1050_v11  ;;  %432 = vmatpush.bf16.msra.mxu3 %v887_v41  ;;  %v1086_v11 = vld [vmem:[#allocation10 + $0x70] sm:$0xff]  ;;  %v1091_v34 = vld [vmem:[#allocation11 + $0x18] sm:$0xff]  ;;  %v330_v35 = vld [vmem:[#allocation14 + $0x2] ss:$8 sm:$0x3] }
  0x3b   :  { %v1090_v36 = vld [vmem:[#allocation11 + $0x10] sm:$0xff]  ;;  %v332_v37 = vperm.slane %v330_v35, 0  ;;  %v333_v38 = vperm.slane %v330_v35, 1  ;;  %v1089_v49 = vld [vmem:[#allocation11 + $0x8] sm:$0xff]  ;;  %v1088_v50 = vld [vmem:[#allocation11] sm:$0xff] }
  0x3c   :  { %v1103_v51 = vld [vmem:[#allocation13 + $0x38] sm:$0xff]  ;;  %v1097_v2 = vld [vmem:[#allocation13 + $0x8] sm:$0xff]  ;;  %v1096_v3 = vld [vmem:[#allocation13] sm:$0xff] }
  0x3d   :  { %224 = vmatpush.bf16.msra.mxu0 %v1041_v12  ;;  %420 = vmatpush.bf16.msra.mxu2 %v875_v46  ;;  %v1077_v12 = vld [vmem:[#allocation10 + $0x28] sm:$0xff]  ;;  %v619_v4 = vld [vmem:[#allocation14 + $0x4] ss:$0 sm:$0xff] }
  0x3e   :  { %304 = vmatpush.bf16.msra.mxu1 %v1049_v16  ;;  %433 = vmatpush.bf16.msra.mxu3 %v879_v47  ;;  %v1075_v16 = vld [vmem:[#allocation10 + $0x18] sm:$0xff] }
  0x41   :  { %225 = vmatpush.bf16.msra.mxu0 %v1040_v13  ;;  %421 = vmatpush.bf16.msra.mxu2 %v867_v52  ;;  %v1085_v13 = vld [vmem:[#allocation10 + $0x68] sm:$0xff]  ;;  %v1102_v52 = vld [vmem:[#allocation13 + $0x30] sm:$0xff] }
  0x42   :  { %305 = vmatpush.bf16.msra.mxu1 %v1048_v17  ;;  %434 = vmatpush.bf16.msra.mxu3 %v871_v53  ;;  %v1083_v17 = vld [vmem:[#allocation10 + $0x58] sm:$0xff]  ;;  %v1101_v53 = vld [vmem:[#allocation13 + $0x28] sm:$0xff] }
  0x44   :  { %226 = vmatmul.bf16.vlgmr.msra.gmra.mxu0 %v152_v15  ;;  %v1084_v15 = vld [vmem:[#allocation10 + $0x60] sm:$0xff] }
  0x45   :  { %422 = vmatpush.bf16.msra.mxu2 %v859_v63  ;;  %575 = vmatpush.bf16.msrb.mxu0 %v1079_v8 }
  0x46   :  { %435 = vmatpush.bf16.msra.mxu3 %v863_v1  ;;  %588 = vmatpush.bf16.msrb.mxu1 %v1087_v9 }
  0x49   :  { %423 = vmatpush.bf16.msra.mxu2 %v851_v5  ;;  %576 = vmatpush.bf16.msrb.mxu0 %v1078_v10  ;;  %v699_v10 = vld [vmem:[#allocation14 + $0x5] ss:$0 sm:$0xff] }
  0x4a   :  { %436 = vmatpush.bf16.msra.mxu3 %v855_v7  ;;  %589 = vmatpush.bf16.msrb.mxu1 %v1086_v11 }
  0x4d   :  { %577 = vmatpush.bf16.msrb.mxu0 %v1077_v12  ;;  %668 = vmatpush.bf16.msrb.mxu2 %v1095_v30 }
  0x4e   :  { %590 = vmatpush.bf16.msrb.mxu1 %v1085_v13  ;;  %748 = vmatpush.bf16.msrb.mxu3 %v1103_v51 }
  0x51   :  { %578 = vmatpush.bf16.msrb.mxu0 %v1076_v14  ;;  %669 = vmatpush.bf16.msrb.mxu2 %v1094_v31 }
  0x52   :  { %591 = vmatpush.bf16.msrb.mxu1 %v1084_v15  ;;  %749 = vmatpush.bf16.msrb.mxu3 %v1102_v52 }
  0x55   :  { %579 = vmatpush.bf16.msrb.mxu0 %v1075_v16  ;;  %670 = vmatpush.bf16.msrb.mxu2 %v1093_v32 }
  0x56   :  { %592 = vmatpush.bf16.msrb.mxu1 %v1083_v17  ;;  %750 = vmatpush.bf16.msrb.mxu3 %v1101_v53 }
  0x59   :  { %580 = vmatpush.bf16.msrb.mxu0 %v1074_v18  ;;  %671 = vmatpush.bf16.msrb.mxu2 %v1092_v33 }
  0x5a   :  { %593 = vmatpush.bf16.msrb.mxu1 %v1082_v19 }
  0x5d   :  { %581 = vmatpush.bf16.msrb.mxu0 %v1073_v26  ;;  %672 = vmatpush.bf16.msrb.mxu2 %v1091_v34 }
  0x5e   :  { %594 = vmatpush.bf16.msrb.mxu1 %v1081_v27 }
  0x61   :  { %582 = vmatpush.bf16.msrb.mxu0 %v1072_v28  ;;  %673 = vmatpush.bf16.msrb.mxu2 %v1090_v36 }
  0x62   :  { %595 = vmatpush.bf16.msrb.mxu1 %v1080_v29 }
  0x65   :  { %674 = vmatpush.bf16.msrb.mxu2 %v1089_v49 }
  0x69   :  { %675 = vmatpush.bf16.msrb.mxu2 %v1088_v50 }
  0xc1   :  { %v227_v55 = vpop.f32.mrf.mxu0 }
  0xc2   :  { %v228_v56 = vadd.f32 %v227_v55, %v169_v54  ;;  %v1100_v54 = vld [vmem:[#allocation13 + $0x20] sm:$0xff]  ;;  %v1099_v55 = vld [vmem:[#allocation13 + $0x18] sm:$0xff] }
  0xc3   :  { %751 = vmatpush.bf16.msrb.mxu3 %v1100_v54 }
  0xc4   :  { %v231_v57 = vmax.f32 %v228_v56, 0.0  ;;  %v1098_v56 = vld [vmem:[#allocation13 + $0x10] sm:$0xff] }
  0xc6   :  { %v232_v58 = vpack.c.bf16 %v231_v57, %v231_v57  ;;  %v478_v57 = vld [vmem:[#allocation14 + $0x3] ss:$0 sm:$0xff] }
  0xc7   :  { %752 = vmatpush.bf16.msrb.mxu3 %v1099_v55 }
  0xc8   :  { %306 = vmatmul.bf16.vlgmr.msra.gmra.mxu1 %v232_v58 }
  0xc9   :  { %v229_v59 = vpop.f32.mrf.mxu0 }
  0xcb   :  { %753 = vmatpush.bf16.msrb.mxu3 %v1098_v56 }
  0xcf   :  { %754 = vmatpush.bf16.msrb.mxu3 %v1097_v2 }
  0xd3   :  { %755 = vmatpush.bf16.msrb.mxu3 %v1096_v3 }
 0x145   :  { %v307_v21 = vpop.f32.mrf.mxu1 }
 0x146   :  { %v308_v22 = vadd.f32 %v307_v21, %v249_v20 }
 0x148   :  { %v311_v23 = vmax.f32 %v308_v22, 0.0 }
 0x14a   :  { %v312_v24 = vpack.c.bf16 %v311_v23, %v311_v23 }
 0x14c   :  { %424 = vmatmul.bf16.vlgmr.msra.gmra.mxu2 %v312_v24  ;;  %437 = vmatmul.bf16.vlgmr.msra.gmra.mxu3 %v312_v24 }
 0x14d   :  { %v309_v25 = vpop.f32.mrf.mxu1 }
 0x1cf   :  { %v425_v39 = vpop.f32.mrf.mxu2  ;;  %v438_v40 = vpop.f32.mrf.mxu3 }
 0x1d0   :  { %v426_v41 = vadd.f32 %v425_v39, %v332_v37  ;;  %v439_v42 = vadd.f32 %v438_v40, %v333_v38 }
 0x1d2   :  { %v442_v43 = vmax.f32 %v426_v41, 0.0  ;;  %v443_v44 = vmax.f32 %v439_v42, 0.0 }
 0x1d4   :  { %v444_v45 = vpack.c.bf16 %v442_v43, %v442_v43  ;;  %v445_v46 = vpack.c.bf16 %v443_v44, %v443_v44 }
 0x1d6   :  { %583 = vmatmul.bf16.vlgmr.msrb.gmra.mxu0 %v444_v45  ;;  %596 = vmatmul.bf16.vlgmr.msrb.gmra.mxu1 %v445_v46 }
 0x1d7   :  { %v427_v47 = vpop.f32.mrf.mxu2  ;;  %v440_v48 = vpop.f32.mrf.mxu3 }
 0x253   :  { %v584_v58 = vpop.f32.mrf.mxu0  ;;  %v597_v59 = vpop.f32.mrf.mxu1 }
 0x254   :  { %v585_v60 = vadd.f32 %v584_v58, %v478_v57 }
 0x256   :  { %v598_v61 = vadd.f32 %v597_v59, %v585_v60 }
 0x258   :  { %v601_v62 = vmax.f32 %v598_v61, 0.0 }
 0x25a   :  { %v602_v63 = vpack.c.bf16 %v601_v62, %v601_v62 }
 0x25b   :  { %v586_v0 = vpop.f32.mrf.mxu0  ;;  %v599_v1 = vpop.f32.mrf.mxu1 }
 0x25c   :  { %676 = vmatmul.bf16.vlgmr.msrb.gmra.mxu2 %v602_v63 }
 0x2df   :  { %v677_v5 = vpop.f32.mrf.mxu2 }
 0x2e0   :  { %v678_v6 = vadd.f32 %v677_v5, %v619_v4 }
 0x2e2   :  { %v681_v7 = vmax.f32 %v678_v6, 0.0 }
 0x2e4   :  { %v682_v8 = vpack.c.bf16 %v681_v7, %v681_v7 }
 0x2e6   :  { %756 = vmatmul.bf16.vlgmr.msrb.gmra.mxu3 %v682_v8 }
 0x2e7   :  { %v679_v9 = vpop.f32.mrf.mxu2 }
 0x369   :  { %v757_v11 = vpop.f32.mrf.mxu3 }
 0x36a   :  { %v758_v12 = vadd.f32 %v757_v11, %v699_v10 }
 0x36c   :  { %v761_v13 = vmax.f32 %v758_v12, 0.0 }
 0x36e   :  { %762 = vst [vmem:[#allocation16] sm:$0xff] %v761_v13 }
 0x36f   :  { %773 = dma.vmem_to_hbm [thread:$0]  %s769_s13, 128, %s771_s3, [#allocation4]  }
 0x371   :  { %v759_v14 = vpop.f32.mrf.mxu3 }
 0x372   :  { %1343 = dma.done.wait [#allocation4], 128  }
 0x373   :  { %1344 = vsyncadd [#allocation4], 4294967168 }
 0x374   :  { %778 = vsyncpa [#allocation3], 1 }
 0x375   :  { %779 = vsyncpa [#allocation6], 1 }
 0x376   :  { %780 = vsyncpa [#allocation9], 1 }
 0x377   :  { %781 = vsyncpa [#allocation12], 1 }
 0x378   :  { %782 = vsyncpa [#allocation15], 1 }
 0x379   :  { %783 = vsyncpa [#allocation4], 1 }

</bundles_post_ra>
